<compile_context>
chip_gen: v7x
topology: tpu7x:2x2x1
jax: 0.10.0
libtpu: 0.0.40
codegen_flags: <defaults>
</compile_context>

<pallas_src>
import jax
import jax.numpy as jnp
from jax.experimental import pallas as pl
from jax.experimental.pallas import tpu as pltpu


def _mlp_kernel(x_ref, w1_ref, b1_ref, w2_ref, b2_ref, w3_ref, b3_ref, o_ref):
    # x_ref: (TB, D_in) f32; w* bf16; b* f32; o_ref: (TB, D_out) f32.
    # Cast x to bf16 on the VPU (free slot — kernel is HBM-bound).
    x = x_ref[...].astype(jnp.bfloat16)

    # fc1 + sigmoid (MXU bf16 inputs, f32 accumulate; EUP sigmoid in f32).
    h1 = jnp.dot(x, w1_ref[...], preferred_element_type=jnp.float32) + b1_ref[...]
    h1 = jax.nn.sigmoid(h1)

    # fc2 + sigmoid.
    h2 = jnp.dot(h1.astype(jnp.bfloat16), w2_ref[...],
                 preferred_element_type=jnp.float32) + b2_ref[...]
    h2 = jax.nn.sigmoid(h2)

    # fc3 — store the (TB, D_out) result directly (masked vst is cheaper than a
    # padded slab plus a post-kernel slicing pass).
    o = jnp.dot(h2.astype(jnp.bfloat16), w3_ref[...],
                preferred_element_type=jnp.float32) + b3_ref[...]
    o_ref[...] = o.astype(o_ref.dtype)


def prepare_params(params):
    """One-time conversion of f32 params to kernel-ready form.

    Hoisted out of the per-call forward path so the wrapper issues no extra
    XLA cast/pad ops (those cost more than the kernel itself at small B).
    """
    return {
        "w1": params["w1"].astype(jnp.bfloat16),                    # [D_in, H]
        "b1": params["b1"].reshape(1, -1).astype(jnp.float32),      # [1, H]
        "w2": params["w2"].astype(jnp.bfloat16),                    # [H, H]
        "b2": params["b2"].reshape(1, -1).astype(jnp.float32),      # [1, H]
        "w3": params["w3"].astype(jnp.bfloat16),                    # [H, D_out]
        "b3": params["b3"].reshape(1, -1).astype(jnp.float32),      # [1, D_out]
    }


def _choose_tb(B, D_in):
    """Batch-tile size: full block for small B; for large B an even number of
    balanced tiles (megacore on v7x) with the double-buffered f32 x-tile kept
    around 8 MiB per buffer (fits the 32 MiB VMEM limit on every generation)."""
    if B <= 256:
        return B
    per_buf_cap = max(256, ((8 << 20) // (D_in * 4)) // 8 * 8)
    max_tb = min(2048, per_buf_cap)
    n_tiles = max(2, pl.cdiv(B, max_tb))
    if n_tiles % 2:
        n_tiles += 1                     # even tile count -> both v7x TCs busy
    tb = pl.cdiv(B, n_tiles)
    return min(max_tb, ((tb + 7) // 8) * 8)


def old_nn_forward(x, kparams):
    """x: [B, C, H, W] (or already [B, D_in]) f32; kparams from prepare_params."""
    B = x.shape[0]
    x2d = x.reshape(B, -1)               # torch .view(B, -1); stays f32
    D_in = x2d.shape[1]

    w1, b1 = kparams["w1"], kparams["b1"]
    w2, b2 = kparams["w2"], kparams["b2"]
    w3, b3 = kparams["w3"], kparams["b3"]
    H = w1.shape[1]
    D_out = w3.shape[1]

    TB = _choose_tb(B, D_in)
    grid = (pl.cdiv(B, TB),)

    cost = pl.CostEstimate(
        flops=2 * B * (D_in * H + H * H + H * D_out),
        transcendentals=2 * B * H,
        bytes_accessed=(B * D_in * 4                                # x (f32)
                        + (D_in * H + H * H + H * D_out) * 2        # weights (bf16)
                        + (2 * H + D_out) * 4                       # biases (f32)
                        + B * D_out * 4),                           # out (f32)
    )

    out = pl.pallas_call(
        _mlp_kernel,
        out_shape=jax.ShapeDtypeStruct((B, D_out), jnp.float32),
        grid_spec=pltpu.PrefetchScalarGridSpec(
            num_scalar_prefetch=0,
            grid=grid,
            in_specs=[
                pl.BlockSpec((TB, D_in), lambda i: (i, 0)),     # x: batch-tiled
                pl.BlockSpec((D_in, H), lambda i: (0, 0)),      # w1: resident
                pl.BlockSpec((1, H), lambda i: (0, 0)),         # b1: resident
                pl.BlockSpec((H, H), lambda i: (0, 0)),         # w2: resident
                pl.BlockSpec((1, H), lambda i: (0, 0)),         # b2: resident
                pl.BlockSpec((H, D_out), lambda i: (0, 0)),     # w3: resident
                pl.BlockSpec((1, D_out), lambda i: (0, 0)),     # b3: resident
            ],
            out_specs=pl.BlockSpec((TB, D_out), lambda i: (i, 0)),
        ),
        compiler_params=pltpu.CompilerParams(
            dimension_semantics=("parallel",),       # megacore sharding on v7x
            vmem_limit_bytes=32 * 1024 * 1024,       # lift v5e's 16 MiB default
        ),
        cost_estimate=cost,
    )(x2d, w1, b1, w2, b2, w3, b3)

    return out


def init_params(key, D_in, H, D_out):
    """Deterministic init mimicking nn.Linear's U(-1/sqrt(fan_in), 1/sqrt(fan_in))."""
    ks = jax.random.split(key, 6)

    def uniform(k, shape, fan_in):
        bound = 1.0 / jnp.sqrt(jnp.float32(fan_in))
        return jax.random.uniform(k, shape, jnp.float32, -bound, bound)

    return {
        "w1": uniform(ks[0], (D_in, H), D_in),
        "b1": uniform(ks[1], (1, H), D_in),
        "w2": uniform(ks[2], (H, H), H),
        "b2": uniform(ks[3], (1, H), H),
        "w3": uniform(ks[4], (H, D_out), H),
        "b3": uniform(ks[5], (1, D_out), H),
    }


def _reference_bf16(x, p):
    """Mirrors the kernel's numerics: bf16 matmul inputs, f32 accumulation."""
    x2d = x.reshape(x.shape[0], -1).astype(jnp.bfloat16)
    h1 = jnp.dot(x2d, p["w1"].astype(jnp.bfloat16),
                 preferred_element_type=jnp.float32) + p["b1"]
    h1 = jax.nn.sigmoid(h1)
    h2 = jnp.dot(h1.astype(jnp.bfloat16), p["w2"].astype(jnp.bfloat16),
                 preferred_element_type=jnp.float32) + p["b2"]
    h2 = jax.nn.sigmoid(h2)
    return jnp.dot(h2.astype(jnp.bfloat16), p["w3"].astype(jnp.bfloat16),
                   preferred_element_type=jnp.float32) + p["b3"]


def _reference_f32(x, p):
    x2d = x.reshape(x.shape[0], -1).astype(jnp.float32)
    h1 = jax.nn.sigmoid(x2d @ p["w1"] + p["b1"])
    h2 = jax.nn.sigmoid(h1 @ p["w2"] + p["b2"])
    return h2 @ p["w3"] + p["b3"]


if __name__ == "__main__":
    key = jax.random.PRNGKey(0)
    k_x, k_p = jax.random.split(key)

    # Small shapes consistent with the module: image-like NCHW input flattened.
    B, C, Himg, Wimg = 2, 4, 16, 16
    D_in = C * Himg * Wimg          # 1024
    H = 128                         # hidden size
    D_out = 32                      # output size

    x = jax.random.normal(k_x, (B, C, Himg, Wimg), jnp.float32)
    params = init_params(k_p, D_in, H, D_out)

    # One-time, out-of-forward-path weight prep (bf16 cast, bias reshape).
    kparams = prepare_params(params)

    out = old_nn_forward(x, kparams)
    out = jax.block_until_ready(out)
    assert out.shape == (B, D_out), out.shape

    # Tight check vs a reference with identical bf16/f32-accum numerics.
    ref_bf16 = _reference_bf16(x, params)
    assert jnp.allclose(out, ref_bf16, atol=1e-4, rtol=1e-4), \
        "mismatch vs bf16-mirrored reference"

    # Loose sanity check vs the pure-f32 torch-equivalent reference.
    # NOTE: bf16 weights/activations deviate from f32 torch at the ~1e-2 level.
    ref_f32 = _reference_f32(x, params)
    assert jnp.allclose(out, ref_f32, atol=5e-2, rtol=5e-2), \
        "mismatch vs f32 reference"

    print("KERNEL_OK")
</pallas_src>

<mosaic_0001>
module attributes {stable_mosaic.version = 11 : i64} {
  func.func @_mlp_kernel(%arg0: i32, %arg1: memref<2x1024xf32, #tpu.memory_space<vmem>>, %arg2: memref<1024x128xbf16, #tpu.memory_space<vmem>>, %arg3: memref<1x128xf32, #tpu.memory_space<vmem>>, %arg4: memref<128x128xbf16, #tpu.memory_space<vmem>>, %arg5: memref<1x128xf32, #tpu.memory_space<vmem>>, %arg6: memref<128x32xbf16, #tpu.memory_space<vmem>>, %arg7: memref<1x32xf32, #tpu.memory_space<vmem>>, %arg8: memref<2x32xf32, #tpu.memory_space<vmem>>) attributes {dimension_semantics = [#tpu.dimension_semantics<parallel>], iteration_bounds = array<i64: 1>, scalar_prefetch = 0 : i64, scratch_operands = 0 : i64, tpu.core_type = #tpu.core_type<tc>, window_params = [{transform_indices = @transform_0, window_bounds = array<i64: 2, 1024>}, {pipeline_mode = #tpu.pipeline_mode<synchronous>, transform_indices = @transform_1, window_bounds = array<i64: 1024, 128>}, {pipeline_mode = #tpu.pipeline_mode<synchronous>, transform_indices = @transform_2, window_bounds = array<i64: 1, 128>}, {pipeline_mode = #tpu.pipeline_mode<synchronous>, transform_indices = @transform_3, window_bounds = array<i64: 128, 128>}, {pipeline_mode = #tpu.pipeline_mode<synchronous>, transform_indices = @transform_4, window_bounds = array<i64: 1, 128>}, {pipeline_mode = #tpu.pipeline_mode<synchronous>, transform_indices = @transform_5, window_bounds = array<i64: 128, 32>}, {pipeline_mode = #tpu.pipeline_mode<synchronous>, transform_indices = @transform_6, window_bounds = array<i64: 1, 32>}, {transform_indices = @transform_7, window_bounds = array<i64: 2, 32>}]} {
    %c0 = arith.constant 0 : index
    %c0_0 = arith.constant 0 : index
    %0 = vector.load %arg1[%c0, %c0_0] : memref<2x1024xf32, #tpu.memory_space<vmem>>, vector<2x1024xf32>
    %1 = arith.truncf %0 : vector<2x1024xf32> to vector<2x1024xbf16>
    %c0_1 = arith.constant 0 : index
    %c0_2 = arith.constant 0 : index
    %2 = vector.load %arg2[%c0_1, %c0_2] : memref<1024x128xbf16, #tpu.memory_space<vmem>>, vector<1024x128xbf16>
    %cst = arith.constant dense<0.000000e+00> : vector<2x128xf32>
    %3 = tpu.matmul %1, %2, %cst {dimension_numbers = #tpu.dot_dimension_numbers<[1], [0], [0], [1], [0, 0, 1, 1], [], []>} : vector<2x1024xbf16>, vector<1024x128xbf16>, vector<2x128xf32> -> vector<2x128xf32>
    %c0_3 = arith.constant 0 : index
    %c0_4 = arith.constant 0 : index
    %4 = vector.load %arg3[%c0_3, %c0_4] : memref<1x128xf32, #tpu.memory_space<vmem>>, vector<1x128xf32>
    %5 = vector.broadcast %4 : vector<1x128xf32> to vector<2x128xf32>
    %6 = arith.addf %3, %5 : vector<2x128xf32>
    %7 = arith.negf %6 : vector<2x128xf32>
    %8 = math.exp %7 : vector<2x128xf32>
    %cst_5 = arith.constant 1.000000e+00 : f32
    %9 = vector.broadcast %cst_5 : f32 to vector<2x128xf32>
    %10 = arith.addf %9, %8 : vector<2x128xf32>
    %11 = arith.divf %9, %10 : vector<2x128xf32>
    %12 = arith.truncf %11 : vector<2x128xf32> to vector<2x128xbf16>
    %c0_6 = arith.constant 0 : index
    %c0_7 = arith.constant 0 : index
    %13 = vector.load %arg4[%c0_6, %c0_7] : memref<128x128xbf16, #tpu.memory_space<vmem>>, vector<128x128xbf16>
    %cst_8 = arith.constant dense<0.000000e+00> : vector<2x128xf32>
    %14 = tpu.matmul %12, %13, %cst_8 {dimension_numbers = #tpu.dot_dimension_numbers<[1], [0], [0], [1], [0, 0, 1, 1], [], []>} : vector<2x128xbf16>, vector<128x128xbf16>, vector<2x128xf32> -> vector<2x128xf32>
    %c0_9 = arith.constant 0 : index
    %c0_10 = arith.constant 0 : index
    %15 = vector.load %arg5[%c0_9, %c0_10] : memref<1x128xf32, #tpu.memory_space<vmem>>, vector<1x128xf32>
    %16 = vector.broadcast %15 : vector<1x128xf32> to vector<2x128xf32>
    %17 = arith.addf %14, %16 : vector<2x128xf32>
    %18 = arith.negf %17 : vector<2x128xf32>
    %19 = math.exp %18 : vector<2x128xf32>
    %cst_11 = arith.constant 1.000000e+00 : f32
    %20 = vector.broadcast %cst_11 : f32 to vector<2x128xf32>
    %21 = arith.addf %20, %19 : vector<2x128xf32>
    %22 = arith.divf %20, %21 : vector<2x128xf32>
    %23 = arith.truncf %22 : vector<2x128xf32> to vector<2x128xbf16>
    %c0_12 = arith.constant 0 : index
    %c0_13 = arith.constant 0 : index
    %24 = vector.load %arg6[%c0_12, %c0_13] : memref<128x32xbf16, #tpu.memory_space<vmem>>, vector<128x32xbf16>
    %cst_14 = arith.constant dense<0.000000e+00> : vector<2x32xf32>
    %25 = tpu.matmul %23, %24, %cst_14 {dimension_numbers = #tpu.dot_dimension_numbers<[1], [0], [0], [1], [0, 0, 1, 1], [], []>} : vector<2x128xbf16>, vector<128x32xbf16>, vector<2x32xf32> -> vector<2x32xf32>
    %c0_15 = arith.constant 0 : index
    %c0_16 = arith.constant 0 : index
    %26 = vector.load %arg7[%c0_15, %c0_16] : memref<1x32xf32, #tpu.memory_space<vmem>>, vector<1x32xf32>
    %27 = vector.broadcast %26 : vector<1x32xf32> to vector<2x32xf32>
    %28 = arith.addf %25, %27 : vector<2x32xf32>
    %c0_17 = arith.constant 0 : index
    %c0_18 = arith.constant 0 : index
    %29 = vector.load %arg8[%c0_17, %c0_18] : memref<2x32xf32, #tpu.memory_space<vmem>>, vector<2x32xf32>
    tpu.vector_store %arg8[%c0_17, %c0_18], %28 {strides = array<i32>} : memref<2x32xf32, #tpu.memory_space<vmem>>, vector<2x32xf32>,
    return
  }
  func.func @transform_0(%arg0: i32) -> (i32, i32) {
    %c0_i32 = arith.constant 0 : i32
    %c0_i32_0 = arith.constant 0 : i32
    return %arg0, %c0_i32 : i32, i32
  }
  func.func @transform_1(%arg0: i32) -> (i32, i32) {
    %c0_i32 = arith.constant 0 : i32
    %c0_i32_0 = arith.constant 0 : i32
    %c0_i32_1 = arith.constant 0 : i32
    return %c0_i32, %c0_i32_0 : i32, i32
  }
  func.func @transform_2(%arg0: i32) -> (i32, i32) {
    %c0_i32 = arith.constant 0 : i32
    %c0_i32_0 = arith.constant 0 : i32
    %c0_i32_1 = arith.constant 0 : i32
    return %c0_i32, %c0_i32_0 : i32, i32
  }
  func.func @transform_3(%arg0: i32) -> (i32, i32) {
    %c0_i32 = arith.constant 0 : i32
    %c0_i32_0 = arith.constant 0 : i32
    %c0_i32_1 = arith.constant 0 : i32
    return %c0_i32, %c0_i32_0 : i32, i32
  }
  func.func @transform_4(%arg0: i32) -> (i32, i32) {
    %c0_i32 = arith.constant 0 : i32
    %c0_i32_0 = arith.constant 0 : i32
    %c0_i32_1 = arith.constant 0 : i32
    return %c0_i32, %c0_i32_0 : i32, i32
  }
  func.func @transform_5(%arg0: i32) -> (i32, i32) {
    %c0_i32 = arith.constant 0 : i32
    %c0_i32_0 = arith.constant 0 : i32
    %c0_i32_1 = arith.constant 0 : i32
    return %c0_i32, %c0_i32_0 : i32, i32
  }
  func.func @transform_6(%arg0: i32) -> (i32, i32) {
    %c0_i32 = arith.constant 0 : i32
    %c0_i32_0 = arith.constant 0 : i32
    %c0_i32_1 = arith.constant 0 : i32
    return %c0_i32, %c0_i32_0 : i32, i32
  }
  func.func @transform_7(%arg0: i32) -> (i32, i32) {
    %c0_i32 = arith.constant 0 : i32
    %c0_i32_0 = arith.constant 0 : i32
    return %arg0, %c0_i32 : i32, i32
  }
}

</mosaic_0001>

<bundles_post_ra>
// kernel: tpu_custom_call.1
= control target key start
LH: loop header
LB: loop body
LE: loop exit
PB: predicated region body
PF: predicated region fallthrough
CT: control target
= control target key end

     0   :  { %12 = vsyncpa [#allocation3], 0  ;;  %s1562_s0 = inlined_call_operand.vmem [shape: f32[2,1024], index: 0, kind: input, shape index: {}]   ;;  %s1563_s1 = inlined_call_operand.hbm [shape: bf16[1024,128], index: 1, kind: input, shape index: {}]   ;;  %s1564_s2 = inlined_call_operand.vmem [shape: f32[1,128], index: 2, kind: input, shape index: {}]   ;;  %s1565_s3 = inlined_call_operand.vmem [shape: bf16[128,128], index: 3, kind: input, shape index: {}]   ;;  %s1566_s4 = inlined_call_operand.vmem [shape: f32[1,128], index: 4, kind: input, shape index: {}]   ;;  %s1567_s5 = inlined_call_operand.vmem [shape: bf16[128,32], index: 5, kind: input, shape index: {}]   ;;  %s1568_s6 = inlined_call_operand.vmem [shape: f32[1,32], index: 6, kind: input, shape index: {}]   ;;  %s1569_s7 = inlined_call_operand.hbm [shape: f32[2,32], index: 7, kind: output, shape index: {}]  }
   0x1   :  { %13 = vsyncpa [#allocation4], 0  ;;  %s1404_s24 = smov [#allocation2]   ;;  %s1356_s28 = scalar_lea.hbm %s1563_s1, 8192 }
   0x2   :  { %s21_s25 = sshll.u32 %s1404_s24, 4  ;;  %p1357_p0 = scmp.ne.s32.totalorder %s1563_s1, %s1356_s28  ;;  %s22_s25 = int_to_ptr.vmem [resolvable:$true] %s21_s25 }
   0x3   :  { %p1360_p1 = scmp.lt.u32.totalorder %s1356_s28, %s1563_s1 }
   0x5   :  { %p1362_p2 = pnand %p1360_p1, %p1357_p0 }
   0x7   :  { %1365 = shalt.err (!%p1362_p2)
}
   0x8   :  { %s1366_s10 = scalar_lea.vmem %s22_s25, 8192  ;;  %p1371_p4 = scmp.lt.s32.totalorder %s22_s25, %s22_s25 }
   0x9   :  { %p1367_p3 = scmp.ne.s32.totalorder %s22_s25, %s1366_s10  ;;  %p1372_p5 = scmp.lt.s32.totalorder %s1366_s10, %s1366_s10 }
   0xb   :  { %p1373_p6 = por %p1372_p5, %p1371_p4 }
   0xd   :  { %p1374_p7 = pnand %p1373_p6, %p1367_p3 }
   0xf   :  { %1377 = shalt.err (!%p1374_p7)
}
  0x10   :  { %s1405_s11 = smov 64   ;;  %s1406_s12 = smov 4  }
  0x11   :  { %27 = dma.hbm_to_vmem [thread:$0]  %s1563_s1, 8192, %s22_s25, [#allocation3], %s1405_s11, %s1405_s11, %s1406_s12  }
  0x12   :  { %1400 = dma.done.wait [#allocation3], 8192  }
  0x13   :  { %1401 = vsyncadd [#allocation3], 4294959104  ;;  %v1266_v0 = vld [vmem:[#allocation2 + $0x40] sm:$0xff]   ;;  %v1270_v4 = vld [vmem:[#allocation2 + $0x48] sm:$0xff]   ;;  %v1407_v22 = vmov 1983009808   ;;  %v50_v24 = vlaneseq }
  0x14   :  { %v1267_v1 = vld [vmem:[#allocation2 + $0xc0] sm:$0xff]   ;;  %1113 = vmatprep.subr.bf16.mxu0 %v1266_v0  ;;  %v1271_v5 = vld [vmem:[#allocation2 + $0xc8] sm:$0xff]   ;;  %v1274_v8 = vld [vmem:[#allocation2 + $0x50] sm:$0xff]   ;;  %v48_v23 = vunpack.c.l.s4 %v1407_v22  ;;  %vm1409_vm0 = vmmov 0   ;;  %s1410_s27 = smov [#allocation5]   ;;  %vm1011_vm1 = vcmask 254976  }
  0x15   :  { %v1268_v2 = vld [vmem:[#allocation2] sm:$0xff]   ;;  %1135 = vmatprep.subr.bf16.mxu1 %v1267_v1  ;;  %v1272_v6 = vld [vmem:[#allocation2 + $0x8] sm:$0xff]   ;;  %v1275_v9 = vld [vmem:[#allocation2 + $0xd0] sm:$0xff]   ;;  %v51_v30 = vshrl.u32 %v50_v24, 7  ;;  %s1019_s28 = sshll.u32 %s1410_s27, 4  ;;  %s1020_s28 = int_to_ptr.vmem [resolvable:$true] %s1019_s28 }
  0x16   :  { %v1269_v3 = vld [vmem:[#allocation2 + $0x80] sm:$0xff]   ;;  %1114 = vmatpush3.bf16.msra.mxu0 %v1268_v2  ;;  %v1273_v7 = vld [vmem:[#allocation2 + $0x88] sm:$0xff]   ;;  %v1276_v10 = vld [vmem:[#allocation2 + $0x10] sm:$0xff]   ;;  %v49_v29 = vunpack.c.0.s8 %v48_v23  ;;  %p1383_p9 = scmp.lt.s32.totalorder %s1020_s28, %s1020_s28 }
  0x17   :  { %1136 = vmatpush3.bf16.msra.mxu1 %v1269_v3  ;;  %1115 = vmatprep.subr.bf16.mxu0 %v1270_v4  ;;  %v1277_v11 = vld [vmem:[#allocation2 + $0x90] sm:$0xff]   ;;  %v1278_v12 = vld [vmem:[#allocation2 + $0x58] sm:$0xff]   ;;  %v1282_v16 = vld [vmem:[#allocation2 + $0x60] sm:$0xff]  }
  0x18   :  { %1137 = vmatprep.subr.bf16.mxu1 %v1271_v5  ;;  %v1279_v13 = vld [vmem:[#allocation2 + $0xd8] sm:$0xff]   ;;  %v1283_v17 = vld [vmem:[#allocation2 + $0xe0] sm:$0xff]   ;;  %v1286_v20 = vld [vmem:[#allocation2 + $0x68] sm:$0xff]   ;;  %v1463_v35 = vsub.s32 %v49_v29, %v51_v30 }
  0x19   :  { %v1280_v14 = vld [vmem:[#allocation2 + $0x18] sm:$0xff]   ;;  %v1284_v18 = vld [vmem:[#allocation2 + $0x20] sm:$0xff]   ;;  %v1287_v21 = vld [vmem:[#allocation2 + $0xe8] sm:$0xff]  }
  0x1a   :  { %1116 = vmatpush3.bf16.msra.mxu0 %v1272_v6  ;;  %v1281_v15 = vld [vmem:[#allocation2 + $0x98] sm:$0xff]   ;;  %v1285_v19 = vld [vmem:[#allocation2 + $0xa0] sm:$0xff]   ;;  %v1288_v25 = vld [vmem:[#allocation2 + $0x28] sm:$0xff]  }
  0x1b   :  { %1138 = vmatpush3.bf16.msra.mxu1 %v1273_v7  ;;  %1117 = vmatprep.subr.bf16.mxu0 %v1274_v8  ;;  %v1289_v26 = vld [vmem:[#allocation2 + $0xa8] sm:$0xff]   ;;  %v1290_v27 = vld [vmem:[#allocation2 + $0x70] sm:$0xff]   ;;  %v1294_v33 = vld [vmem:[#allocation2 + $0x78] sm:$0xff]  }
  0x1c   :  { %1139 = vmatprep.subr.bf16.mxu1 %v1275_v9  ;;  %v1291_v28 = vld [vmem:[#allocation2 + $0xf0] sm:$0xff]   ;;  %v1295_v34 = vld [vmem:[#allocation2 + $0xf8] sm:$0xff]   ;;  %v42_v38 = vld [vmem:[%s1562_s0] sm:$0xff] }
  0x1d   :  { %v1292_v31 = vld [vmem:[#allocation2 + $0x30] sm:$0xff]   ;;  %v1296_v36 = vld [vmem:[#allocation2 + $0x38] sm:$0xff]   ;;  %v53_v39 = vrot.slane %v42_v38, %v1463_v35  ;;  %v46_v40 = vcombine.high %v42_v38, %v42_v38  ;;  %v1299_v41 = vld [vmem:[#allocation2 + $0x140] sm:$0xff]  }
  0x1e   :  { %1118 = vmatpush3.bf16.msra.mxu0 %v1276_v10  ;;  %v1293_v32 = vld [vmem:[#allocation2 + $0xb0] sm:$0xff]   ;;  %v1297_v37 = vld [vmem:[#allocation2 + $0xb8] sm:$0xff]   ;;  %v1300_v42 = vld [vmem:[#allocation2 + $0x1c0] sm:$0xff]  }
  0x1f   :  { %1140 = vmatpush3.bf16.msra.mxu1 %v1277_v11  ;;  %1119 = vmatprep.subr.bf16.mxu0 %v1278_v12  ;;  %v61_v43 = vcombine.high %v53_v39, %v53_v39  ;;  %v60_v44 = vrot.slane %v46_v40, %v1463_v35  ;;  %v88_v45 = vpack.c.bf16 %v53_v39, %v53_v39  ;;  %v1301_v46 = vld [vmem:[#allocation2 + $0x100] sm:$0xff]   ;;  %v1303_v51 = vld [vmem:[#allocation2 + $0x148] sm:$0xff]   ;;  %v1307_v56 = vld [vmem:[#allocation2 + $0x150] sm:$0xff]  }
  0x20   :  { %1141 = vmatprep.subr.bf16.mxu1 %v1279_v13  ;;  %v1302_v49 = vld [vmem:[#allocation2 + $0x180] sm:$0xff]   ;;  %v1304_v53 = vld [vmem:[#allocation2 + $0x1c8] sm:$0xff]   ;;  %v1308_v57 = vld [vmem:[#allocation2 + $0x1d0] sm:$0xff]  }
  0x21   :  { %v89_v47 = vpack.c.bf16 %v61_v43, %v61_v43  ;;  %v62_v48 = vcombine.high %v60_v44, %v60_v44  ;;  %v90_v50 = vpack.c.bf16 %v60_v44, %v60_v44  ;;  %v1305_v54 = vld [vmem:[#allocation2 + $0x108] sm:$0xff]   ;;  %v1309_v58 = vld [vmem:[#allocation2 + $0x110] sm:$0xff]   ;;  %v1311_v60 = vld [vmem:[#allocation2 + $0x158] sm:$0xff]  }
  0x22   :  { %1120 = vmatpush3.bf16.msra.mxu0 %v1280_v14  ;;  %v1306_v55 = vld [vmem:[#allocation2 + $0x188] sm:$0xff]   ;;  %v1310_v59 = vld [vmem:[#allocation2 + $0x190] sm:$0xff]   ;;  %v1312_v61 = vld [vmem:[#allocation2 + $0x1d8] sm:$0xff]  }
  0x23   :  { %1142 = vmatpush3.bf16.msra.mxu1 %v1281_v15  ;;  %1121 = vmatprep.subr.bf16.mxu0 %v1282_v16  ;;  %v91_v52 = vpack.c.bf16 %v62_v48, %v62_v48  ;;  %v1313_v62 = vld [vmem:[#allocation2 + $0x118] sm:$0xff]   ;;  %v1315_v0 = vld [vmem:[#allocation2 + $0x160] sm:$0xff]   ;;  %v1319_v4 = vld [vmem:[#allocation2 + $0x168] sm:$0xff]  }
  0x24   :  { %1143 = vmatprep.subr.bf16.mxu1 %v1283_v17  ;;  %647 = vmatprep.mubr.bf16.mxu0 %v89_v47  ;;  %v1314_v63 = vld [vmem:[#allocation2 + $0x198] sm:$0xff]   ;;  %v1316_v1 = vld [vmem:[#allocation2 + $0x1e0] sm:$0xff]   ;;  %v1320_v5 = vld [vmem:[#allocation2 + $0x1e8] sm:$0xff]  }
  0x25   :  { %687 = vmatprep.mubr.bf16.mxu1 %v91_v52  ;;  %v1317_v2 = vld [vmem:[#allocation2 + $0x120] sm:$0xff]   ;;  %v1321_v6 = vld [vmem:[#allocation2 + $0x128] sm:$0xff]   ;;  %v1323_v8 = vld [vmem:[#allocation2 + $0x170] sm:$0xff]  }
  0x26   :  { %1122 = vmatpush3.bf16.msra.mxu0 %v1284_v18  ;;  %v1318_v3 = vld [vmem:[#allocation2 + $0x1a0] sm:$0xff]   ;;  %v1322_v7 = vld [vmem:[#allocation2 + $0x1a8] sm:$0xff]   ;;  %v1324_v9 = vld [vmem:[#allocation2 + $0x1f0] sm:$0xff]  }
  0x27   :  { %1144 = vmatpush3.bf16.msra.mxu1 %v1285_v19  ;;  %1123 = vmatprep.subr.bf16.mxu0 %v1286_v20  ;;  %v1325_v10 = vld [vmem:[#allocation2 + $0x130] sm:$0xff]   ;;  %v1327_v12 = vld [vmem:[#allocation2 + $0x178] sm:$0xff]   ;;  %v43_v15 = vld [vmem:[%s1562_s0 + $0x8] sm:$0xff] }
  0x28   :  { %1145 = vmatprep.subr.bf16.mxu1 %v1287_v21  ;;  %v1326_v11 = vld [vmem:[#allocation2 + $0x1b0] sm:$0xff]   ;;  %v1328_v13 = vld [vmem:[#allocation2 + $0x1f8] sm:$0xff]   ;;  %v70_v17 = vrot.slane %v43_v15, %v1463_v35  ;;  %v63_v18 = vcombine.high %v43_v15, %v43_v15 }
  0x29   :  { %v1329_v14 = vld [vmem:[#allocation2 + $0x138] sm:$0xff]   ;;  %v1334_v29 = vld [vmem:[%s1565_s3 + $0x10] sm:$0xff]  }
  0x2a   :  { %1124 = vmatpush3.bf16.msra.mxu0 %v1288_v25  ;;  %v1330_v16 = vld [vmem:[#allocation2 + $0x1b8] sm:$0xff]   ;;  %v78_v19 = vcombine.high %v70_v17, %v70_v17  ;;  %v77_v20 = vrot.slane %v63_v18, %v1463_v35  ;;  %v92_v21 = vpack.c.bf16 %v70_v17, %v70_v17 }
  0x2b   :  { %1146 = vmatpush3.bf16.msra.mxu1 %v1289_v26  ;;  %1125 = vmatprep.subr.bf16.mxu0 %v1290_v27  ;;  %v1332_v26 = vld [vmem:[%s1565_s3] sm:$0xff]   ;;  %v1408_v27 = vmov 0.0   ;;  %v1335_v30 = vld [vmem:[%s1565_s3 + $0x18] sm:$0xff]  }
  0x2c   :  { %1147 = vmatprep.subr.bf16.mxu1 %v1291_v28  ;;  %v93_v22 = vpack.c.bf16 %v78_v19, %v78_v19  ;;  %v79_v23 = vcombine.high %v77_v20, %v77_v20  ;;  %v94_v24 = vpack.c.bf16 %v77_v20, %v77_v20  ;;  %v1333_v28 = vld [vmem:[%s1565_s3 + $0x8] sm:$0xff]   ;;  %v1104_v20 = vld [vmem:[%s1568_s6] ss:$0 sm:$0xff] }
  0x2e   :  { %1126 = vmatpush3.bf16.msra.mxu0 %v1292_v31  ;;  %v95_v25 = vpack.c.bf16 %v79_v23, %v79_v23  ;;  %v1336_v31 = vld [vmem:[%s1565_s3 + $0x20] sm:$0xff]  }
  0x2f   :  { %1148 = vmatpush3.bf16.msra.mxu1 %v1293_v32  ;;  %1127 = vmatprep.subr.bf16.mxu0 %v1294_v33  ;;  %v1337_v32 = vld [vmem:[%s1565_s3 + $0x28] sm:$0xff]   ;;  %v1338_v33 = vld [vmem:[%s1565_s3 + $0x30] sm:$0xff]  }
  0x30   :  { %1149 = vmatprep.subr.bf16.mxu1 %v1295_v34  ;;  %v1339_v34 = vld [vmem:[%s1565_s3 + $0x38] sm:$0xff]  }
  0x32   :  { %1128 = vmatpush3.bf16.msra.mxu0 %v1296_v36  ;;  %v1028_v36 = vld [vmem:[%s1564_s2] ss:$0 sm:$0xff] }
  0x33   :  { %1150 = vmatpush3.bf16.msra.mxu1 %v1297_v37  ;;  %1157 = vmatprep.subr.bf16.mxu0 %v1299_v41 }
  0x34   :  { %1179 = vmatprep.subr.bf16.mxu1 %v1300_v42 }
  0x35   :  { %648 = vmatmul.mubr.bf16.vlgmr.msra.gmra.mrb[0].mxu0 %v88_v45 }
  0x36   :  { %1158 = vmatpush3.bf16.msra.mxu0 %v1301_v46  ;;  %688 = vmatmul.mubr.bf16.vlgmr.msra.gmra.mrb[0].mxu1 %v90_v50 }
  0x37   :  { %1159 = vmatprep.subr.bf16.mxu0 %v1303_v51  ;;  %1180 = vmatpush3.bf16.msra.mxu1 %v1302_v49 }
  0x38   :  { %1181 = vmatprep.subr.bf16.mxu1 %v1304_v53  ;;  %727 = vmatprep.mubr.bf16.mxu0 %v93_v22 }
  0x39   :  { %767 = vmatprep.mubr.bf16.mxu1 %v95_v25 }
  0x3a   :  { %1160 = vmatpush3.bf16.msra.mxu0 %v1305_v54 }
  0x3b   :  { %1161 = vmatprep.subr.bf16.mxu0 %v1307_v56  ;;  %1182 = vmatpush3.bf16.msra.mxu1 %v1306_v55 }
  0x3c   :  { %1183 = vmatprep.subr.bf16.mxu1 %v1308_v57 }
  0x3e   :  { %1162 = vmatpush3.bf16.msra.mxu0 %v1309_v58 }
  0x3f   :  { %1163 = vmatprep.subr.bf16.mxu0 %v1311_v60  ;;  %1184 = vmatpush3.bf16.msra.mxu1 %v1310_v59 }
  0x40   :  { %1185 = vmatprep.subr.bf16.mxu1 %v1312_v61 }
  0x42   :  { %1164 = vmatpush3.bf16.msra.mxu0 %v1313_v62 }
  0x43   :  { %1165 = vmatprep.subr.bf16.mxu0 %v1315_v0  ;;  %1186 = vmatpush3.bf16.msra.mxu1 %v1314_v63 }
  0x44   :  { %1187 = vmatprep.subr.bf16.mxu1 %v1316_v1  ;;  %v1340_v1 = vld [vmem:[%s1567_s5] sm:$0xff]  }
  0x46   :  { %1166 = vmatpush3.bf16.msra.mxu0 %v1317_v2  ;;  %v1341_v2 = vld [vmem:[%s1567_s5 + $0x8] sm:$0xff]  }
  0x47   :  { %1167 = vmatprep.subr.bf16.mxu0 %v1319_v4  ;;  %1188 = vmatpush3.bf16.msra.mxu1 %v1318_v3  ;;  %v1342_v3 = vld [vmem:[%s1567_s5 + $0x10] sm:$0xff]   ;;  %v1343_v4 = vld [vmem:[%s1567_s5 + $0x18] sm:$0xff]  }
  0x48   :  { %1189 = vmatprep.subr.bf16.mxu1 %v1320_v5  ;;  %v1344_v5 = vld [vmem:[%s1567_s5 + $0x20] sm:$0xff]  }
  0x4a   :  { %1168 = vmatpush3.bf16.msra.mxu0 %v1321_v6  ;;  %v1345_v6 = vld [vmem:[%s1567_s5 + $0x28] sm:$0xff]  }
  0x4b   :  { %1169 = vmatprep.subr.bf16.mxu0 %v1323_v8  ;;  %1190 = vmatpush3.bf16.msra.mxu1 %v1322_v7  ;;  %v1346_v7 = vld [vmem:[%s1567_s5 + $0x30] sm:$0xff]   ;;  %v1347_v8 = vld [vmem:[%s1567_s5 + $0x38] sm:$0xff]  }
  0x4c   :  { %1191 = vmatprep.subr.bf16.mxu1 %v1324_v9  ;;  %v1094_v9 = vld [vmem:[%s1566_s4] ss:$0 sm:$0xff]  ;;  %s1378_s4 = scalar_lea.vmem %s1020_s28, 32 }
  0x4d   :  { %p1379_p8 = scmp.ne.s32.totalorder %s1020_s28, %s1378_s4  ;;  %p1384_p10 = scmp.lt.s32.totalorder %s1378_s4, %s1378_s4 }
  0x4e   :  { %1170 = vmatpush3.bf16.msra.mxu0 %v1325_v10 }
  0x4f   :  { %1171 = vmatprep.subr.bf16.mxu0 %v1327_v12  ;;  %1192 = vmatpush3.bf16.msra.mxu1 %v1326_v11  ;;  %p1385_p11 = por %p1384_p10, %p1383_p9 }
  0x50   :  { %1193 = vmatprep.subr.bf16.mxu1 %v1328_v13 }
  0x51   :  { %p1386_p12 = pnand %p1385_p11, %p1379_p8 }
  0x52   :  { %1172 = vmatpush3.bf16.msra.mxu0 %v1329_v14 }
  0x53   :  { %1194 = vmatpush3.bf16.msra.mxu1 %v1330_v16  ;;  %1219 = vmatprep.subr.bf16.mxu0 %v1408_v27 }
  0x54   :  { %1239 = vmatprep.subr.bf16.mxu1 %v1408_v27 }
  0x55   :  { %728 = vmatmul.mubr.bf16.vlgmr.msra.gmra.mrb[4].mxu0 %v92_v21 }
  0x56   :  { %768 = vmatmul.mubr.bf16.vlgmr.msra.gmra.mrb[4].mxu1 %v94_v24  ;;  %1220 = vmatpush3.bf16.msra.mxu0 %v1332_v26 }
  0x57   :  { %1221 = vmatprep.subr.bf16.mxu0 %v1408_v27  ;;  %1235 = vmatprep.mubr.msk.bf16.mxu0 %vm1409_vm0, %v1408_v27 }
  0x58   :  { %1255 = vmatprep.mubr.msk.bf16.mxu1 %vm1409_vm0, %v1408_v27  ;;  %1240 = vmatpush3.bf16.msra.mxu1 %v1340_v1 }
  0x59   :  { %1241 = vmatprep.subr.bf16.mxu1 %v1408_v27 }
  0x5a   :  { %1222 = vmatpush3.bf16.msra.mxu0 %v1333_v28 }
  0x5b   :  { %1223 = vmatprep.subr.bf16.mxu0 %v1408_v27 }
  0x5c   :  { %1242 = vmatpush3.bf16.msra.mxu1 %v1341_v2 }
  0x5d   :  { %1243 = vmatprep.subr.bf16.mxu1 %v1408_v27 }
  0x5e   :  { %1224 = vmatpush3.bf16.msra.mxu0 %v1334_v29 }
  0x5f   :  { %1225 = vmatprep.subr.bf16.mxu0 %v1408_v27 }
  0x60   :  { %1244 = vmatpush3.bf16.msra.mxu1 %v1342_v3 }
  0x61   :  { %1245 = vmatprep.subr.bf16.mxu1 %v1408_v27 }
  0x62   :  { %1226 = vmatpush3.bf16.msra.mxu0 %v1335_v30 }
  0x63   :  { %1227 = vmatprep.subr.bf16.mxu0 %v1408_v27 }
  0x64   :  { %1246 = vmatpush3.bf16.msra.mxu1 %v1343_v4 }
  0x65   :  { %1247 = vmatprep.subr.bf16.mxu1 %v1408_v27 }
  0x66   :  { %1228 = vmatpush3.bf16.msra.mxu0 %v1336_v31 }
  0x67   :  { %1229 = vmatprep.subr.bf16.mxu0 %v1408_v27 }
  0x68   :  { %1248 = vmatpush3.bf16.msra.mxu1 %v1344_v5 }
  0x69   :  { %1249 = vmatprep.subr.bf16.mxu1 %v1408_v27 }
  0x6a   :  { %1230 = vmatpush3.bf16.msra.mxu0 %v1337_v32 }
  0x6b   :  { %1231 = vmatprep.subr.bf16.mxu0 %v1408_v27 }
  0x6c   :  { %1250 = vmatpush3.bf16.msra.mxu1 %v1345_v6 }
  0x6d   :  { %1251 = vmatprep.subr.bf16.mxu1 %v1408_v27 }
  0x6e   :  { %1232 = vmatpush3.bf16.msra.mxu0 %v1338_v33 }
  0x6f   :  { %1233 = vmatprep.subr.bf16.mxu0 %v1408_v27 }
  0x70   :  { %1252 = vmatpush3.bf16.msra.mxu1 %v1346_v7 }
  0x71   :  { %1253 = vmatprep.subr.bf16.mxu1 %v1408_v27 }
  0x72   :  { %1234 = vmatpush3.bf16.msra.mxu0 %v1339_v34 }
  0x74   :  { %1254 = vmatpush3.bf16.msra.mxu1 %v1347_v8 }
 0x108   :  { %v1129_v35 = vpop.f32.mrb[0].mxu0 }
 0x109   :  { %v1130_v37 = vpop.f32.mrb[1].mxu0  ;;  %v1151_v38 = vpop.f32.mrb[0].mxu1 }
 0x10a   :  { %v1131_v39 = vadd.f32 %v1130_v37, %v1129_v35  ;;  %v1132_v40 = vpop.f32.mrb[2].mxu0  ;;  %v1152_v41 = vpop.f32.mrb[1].mxu1 }
 0x10b   :  { %v1133_v42 = vpop.f32.mrb[3].mxu0  ;;  %v1153_v44 = vadd.f32 %v1152_v41, %v1151_v38  ;;  %v1154_v45 = vpop.f32.mrb[2].mxu1 }
 0x10c   :  { %v650_v43 = vadd.f32 %v1131_v39, %v1028_v36  ;;  %v1155_v46 = vpop.f32.mrb[3].mxu1 }
 0x10e   :  { %v690_v47 = vadd.f32 %v1153_v44, %v650_v43 }
 0x128   :  { %v1173_v48 = vpop.f32.mrb[4].mxu0 }
 0x129   :  { %v1174_v49 = vpop.f32.mrb[5].mxu0  ;;  %v1195_v50 = vpop.f32.mrb[4].mxu1 }
 0x12a   :  { %v1175_v51 = vadd.f32 %v1174_v49, %v1173_v48  ;;  %v1176_v52 = vpop.f32.mrb[6].mxu0  ;;  %v1196_v53 = vpop.f32.mrb[5].mxu1 }
 0x12b   :  { %v1177_v54 = vpop.f32.mrb[7].mxu0  ;;  %v1197_v56 = vadd.f32 %v1196_v53, %v1195_v50  ;;  %v1198_v57 = vpop.f32.mrb[6].mxu1 }
 0x12c   :  { %v730_v55 = vadd.f32 %v1175_v51, %v690_v47  ;;  %v1199_v58 = vpop.f32.mrb[7].mxu1 }
 0x12e   :  { %v770_v59 = vadd.f32 %v1197_v56, %v730_v55 }
 0x130   :  { %v1093_v60 = vmul.f32 -1.442695, %v770_v59 }
 0x132   :  { %1348 = vpow2.f32 %v1093_v60 }
 0x13c   :  { %v1349_v61 = vpop.eup %1348 }
 0x13d   :  { %v778_v62 = vadd.f32 1.0, %v1349_v61 }
 0x13f   :  { %1350 = vrcp.f32 %v778_v62 }
 0x149   :  { %v1351_v63 = vpop.eup %1350 }
 0x14a   :  { %v781_v0 = vpack.c.bf16 %v1351_v63, %v1351_v63 }
 0x14c   :  { %1236 = vmatmul.mubr.bf16.vlgmr.msra.gmra.mrb[8].mxu0 %v781_v0 }
 0x21f   :  { %v887_v10 = vpop.f32.mrb[8].mxu0 }
 0x220   :  { %v888_v11 = vadd.f32 %v1094_v9, %v887_v10  ;;  %v1237_v12 = vpop.f32.mrb[9].mxu0 }
 0x221   :  { %v890_v13 = vpop.f32.mrb[10].mxu0 }
 0x222   :  { %v1103_v14 = vmul.f32 -1.442695, %v888_v11  ;;  %v1238_v15 = vpop.f32.mrb[11].mxu0 }
 0x224   :  { %1352 = vpow2.f32 %v1103_v14 }
 0x22e   :  { %v1353_v16 = vpop.eup %1352 }
 0x22f   :  { %v896_v17 = vadd.f32 1.0, %v1353_v16 }
 0x231   :  { %1354 = vrcp.f32 %v896_v17 }
 0x23b   :  { %v1355_v18 = vpop.eup %1354 }
 0x23c   :  { %v899_v19 = vpack.c.bf16 %v1355_v18, %v1355_v18 }
 0x23e   :  { %1256 = vmatmul.mubr.bf16.vlgmr.msra.gmra.mrb[8].mxu1 %v899_v19 }
 0x311   :  { %v1005_v21 = vpop.f32.mrb[8].mxu1 }
 0x312   :  { %v1006_v22 = vadd.f32 %v1104_v20, %v1005_v21  ;;  %v1257_v23 = vpop.f32.mrb[9].mxu1 }
 0x313   :  { %v1008_v24 = vpop.f32.mrb[10].mxu1 }
 0x314   :  { %v1258_v25 = vpop.f32.mrb[11].mxu1  ;;  %1012 = vst.msk [vmem:[#allocation5] sm:$0x3] %vm1011_vm1, %v1006_v22 }
 0x315   :  { %1389 = shalt.err (!%p1386_p12)
}
 0x316   :  { %s1390_s6 = scalar_lea.hbm %s1569_s7, 32 }
 0x317   :  { %p1391_p13 = scmp.ne.s32.totalorder %s1569_s7, %s1390_s6  ;;  %p1394_p0 = scmp.lt.u32.totalorder %s1390_s6, %s1569_s7 }
 0x319   :  { %p1396_p1 = pnand %p1394_p0, %p1391_p13 }
 0x31b   :  { %1399 = shalt.err (!%p1396_p1)
}
 0x31c   :  { %1022 = dma.vmem_to_hbm [thread:$0]  %s1020_s28, 32, %s1569_s7, [#allocation4]  }
 0x31d   :  { %1402 = dma.done.wait [#allocation4], 32  }
 0x31e   :  { %1403 = vsyncadd [#allocation4], 4294967264 }
 0x31f   :  { %1026 = vsyncpa [#allocation3], 1 }
 0x320   :  { %1027 = vsyncpa [#allocation4], 1 }

</bundles_post_ra>
